<compile_context>
chip_gen: v5e
topology: v5e:2x2
jax: 0.10.0
libtpu: 0.0.40
codegen_flags: <defaults>
</compile_context>

<pallas_src>
import jax
import jax.numpy as jnp
from jax.experimental import pallas as pl
from jax.experimental.pallas import tpu as pltpu


def _fused_pointwise_kernel(x_ref, w_ref, b_ref, o_ref):
    """One (batch, L-tile) block through the fused affine map.

    x_ref : (Cin, tL)   lane-dense NCL tile (batch dim squeezed)
    w_ref : (Cout, Cin) fused weight (resident, constant index_map), f32
    b_ref : (Cout, 1)   fused bias, f32
    o_ref : (Cout, tL)
    """
    cin = x_ref.shape[0]
    x = x_ref[...].astype(jnp.float32)            # (Cin, tL)
    w = w_ref[...]                                # (Cout, Cin)
    # Unrolled VPU contraction over the (tiny, static) Cin axis:
    #   acc[o, l] = sum_c w[o, c] * x[c, l]
    acc = w[:, 0:1] * x[0:1, :]
    for c in range(1, cin):
        acc = acc + w[:, c:c + 1] * x[c:c + 1, :]
    o_ref[...] = (acc + b_ref[...]).astype(o_ref.dtype)


def _pad8(n):
    return -(-n // 8) * 8


def _choose_tile_l(L, B, max_tile, min_grid_steps):
    """Pick the lane tile for the position axis.

    Returns (tile_l, need_pad). Preferences:
      (a) no wrapper pad/slice (extra HBM passes),
      (b) tile fits the VMEM budget (max_tile),
      (c) >= min_grid_steps total grid steps (v7x megacore + DMA overlap),
      (d) never below 128 lanes (lane-dense stores).
    """
    want_l_tiles = -(-min_grid_steps // max(B, 1))          # ceil
    if L <= max_tile and want_l_tiles <= 1:
        return L, False                                     # full extent
    if L % 128 == 0:
        cap = min(max_tile, max(128, (L // want_l_tiles) // 128 * 128))
        t = cap
        while t >= 128:                                     # largest 128-multiple divisor
            if L % t == 0:
                return t, False
            t -= 128
    if L <= max_tile:
        return L, False          # single L-tile per batch row; still no padding
    # L > budget and no clean multiple-of-128 divisor: pad the ragged tail.
    # TODO(synk): an in-kernel masked tail store would avoid this extra HBM pass.
    return max_tile, True


def distribution_encoder_1d(s_t, params, *, vmem_budget_bytes=16 << 20,
                            max_lane_tile=65536, min_grid_steps=8):
    """Forward pass of DistributionEncoder1D.

    s_t    : (B, Cin, L) NCL layout (matches PyTorch Conv1d input), f32 or bf16
    params : dict with w1..w4 stored as (in, out) and b1..b4 stored as (1, out)
    returns: (B, Cout, L) same dtype as s_t
    """
    B, Cin, L = s_t.shape
    Cout = params["w4"].shape[1]
    io_dtype = s_t.dtype

    # --- Fuse the 4 pointwise convs into a single affine map (tiny, done once
    # in the wrapper; exact up to f32 rounding since there are no activations).
    w_io = params["w1"] @ params["w2"] @ params["w3"] @ params["w4"]        # (Cin, Cout)
    b_io = ((params["b1"] @ params["w2"] + params["b2"]) @ params["w3"]
            + params["b3"]) @ params["w4"] + params["b4"]                   # (1, Cout)
    w_fused = jnp.asarray(w_io.T, jnp.float32)                              # (Cout, Cin)
    b_fused = jnp.asarray(b_io.T, jnp.float32)                              # (Cout, 1)

    # --- VMEM-budgeted lane tile: 2 pipeline buffers each for the x block and
    # the output block; channel counts sublane-pad to 8 in VMEM.
    itemsize = jnp.dtype(io_dtype).itemsize
    bytes_per_lane = 2 * (_pad8(Cin) + _pad8(Cout)) * itemsize
    max_tile = min(max_lane_tile,
                   max(128, (vmem_budget_bytes // bytes_per_lane) // 128 * 128))
    tile_l, need_pad = _choose_tile_l(L, B, max_tile, min_grid_steps)

    if need_pad:
        l_pad = -(-L // tile_l) * tile_l
        x = jnp.pad(s_t, ((0, 0), (0, 0), (0, l_pad - L)))
    else:
        l_pad = L
        x = s_t

    grid = (B, l_pad // tile_l)

    flops = 2 * B * L * Cin * Cout
    bytes_accessed = (B * L * (Cin + Cout)) * itemsize + (Cin * Cout + Cout) * 4

    out = pl.pallas_call(
        _fused_pointwise_kernel,
        out_shape=jax.ShapeDtypeStruct((B, Cout, l_pad), io_dtype),
        grid_spec=pl.GridSpec(
            grid=grid,
            in_specs=[
                # batch dim squeezed out of the kernel view; L on the lane axis
                pl.BlockSpec((None, Cin, tile_l), lambda b_, l_: (b_, 0, l_)),
                # fused weight / bias stay resident in VMEM across the grid
                pl.BlockSpec((Cout, Cin), lambda b_, l_: (0, 0)),
                pl.BlockSpec((Cout, 1), lambda b_, l_: (0, 0)),
            ],
            out_specs=pl.BlockSpec((None, Cout, tile_l),
                                   lambda b_, l_: (b_, 0, l_)),
        ),
        compiler_params=pltpu.CompilerParams(
            dimension_semantics=("parallel", "parallel"),
            vmem_limit_bytes=32 * 1024 * 1024),
        cost_estimate=pl.CostEstimate(
            flops=flops, transcendentals=0, bytes_accessed=bytes_accessed),
    )(x, w_fused, b_fused)

    if l_pad != L:
        out = out[:, :, :L]
    return out


def init_params(key, in_channels, out_channels):
    """Deterministic synthetic init. Conv1d(k=1) weight (O, I, 1) is stored
    transposed as (I, O); bias as (1, O)."""
    hidden = in_channels * 2
    dims = [
        (in_channels, hidden),         # conv1
        (hidden, hidden),              # conv2
        (hidden, in_channels),         # conv3
        (in_channels, out_channels),   # conv4
    ]
    params = {}
    for idx, (cin, cout) in enumerate(dims, start=1):
        key, kw, kb = jax.random.split(key, 3)
        bound = 1.0 / jnp.sqrt(cin)
        params[f"w{idx}"] = jax.random.uniform(
            kw, (cin, cout), jnp.float32, -bound, bound)
        params[f"b{idx}"] = jax.random.uniform(
            kb, (1, cout), jnp.float32, -bound, bound)
    return params


def _reference(s_t, params):
    """Pure-JAX layered reference of the 4 pointwise convs (NCL in / NCL out)."""
    x = jnp.transpose(s_t.astype(jnp.float32), (0, 2, 1))  # (B, L, Cin)
    for i in range(1, 5):
        x = x @ params[f"w{i}"] + params[f"b{i}"]
    return jnp.transpose(x, (0, 2, 1))


if __name__ == "__main__":
    key = jax.random.PRNGKey(0)
    key, kx, kx2 = jax.random.split(key, 3)

    B, Cin, L = 2, 4, 16
    Cout = 8

    params = init_params(key, Cin, Cout)

    # Case 1: tiny L (full-extent single tile per batch row).
    s_t = jax.random.normal(kx, (B, Cin, L), jnp.float32)
    out = jax.block_until_ready(distribution_encoder_1d(s_t, params))
    ref = _reference(s_t, params)
    assert out.shape == (B, Cout, L), out.shape
    # Fusing the 4 layers reorders f32 summation slightly vs the layered ref.
    assert jnp.allclose(out, ref, atol=2e-5, rtol=2e-5), "mismatch (small L)"

    # Case 2: L multiple of 128 with B=1 (exercises the multi-tile lane path).
    L2 = 384
    s_t2 = jax.random.normal(kx2, (1, Cin, L2), jnp.float32)
    out2 = jax.block_until_ready(distribution_encoder_1d(s_t2, params))
    ref2 = _reference(s_t2, params)
    assert out2.shape == (1, Cout, L2), out2.shape
    assert jnp.allclose(out2, ref2, atol=2e-5, rtol=2e-5), "mismatch (tiled L)"

    print("KERNEL_OK")
</pallas_src>

<mosaic_0001>
module attributes {stable_mosaic.version = 11 : i64} {
  func.func @_fused_pointwise_kernel(%arg0: i32, %arg1: i32, %arg2: memref<1x4x16xf32, #tpu.memory_space<vmem>>, %arg3: memref<8x4xf32, #tpu.memory_space<vmem>>, %arg4: memref<8x1xf32, #tpu.memory_space<vmem>>, %arg5: memref<1x8x16xf32, #tpu.memory_space<vmem>>) attributes {dimension_semantics = [#tpu.dimension_semantics<parallel>, #tpu.dimension_semantics<parallel>], iteration_bounds = array<i64: 2, 1>, scalar_prefetch = 0 : i64, scratch_operands = 0 : i64, tpu.core_type = #tpu.core_type<tc>, window_params = [{transform_indices = @transform_0, window_bounds = array<i64: 1, 4, 16>}, {pipeline_mode = #tpu.pipeline_mode<synchronous>, transform_indices = @transform_1, window_bounds = array<i64: 8, 4>}, {pipeline_mode = #tpu.pipeline_mode<synchronous>, transform_indices = @transform_2, window_bounds = array<i64: 8, 1>}, {transform_indices = @transform_3, window_bounds = array<i64: 1, 8, 16>}]} {
    %c0 = arith.constant 0 : index
    %c0_0 = arith.constant 0 : index
    %c0_1 = arith.constant 0 : index
    %0 = vector.load %arg2[%c0, %c0_0, %c0_1] : memref<1x4x16xf32, #tpu.memory_space<vmem>>, vector<1x4x16xf32>
    %1 = vector.shape_cast %0 : vector<1x4x16xf32> to vector<4x16xf32>
    %c0_2 = arith.constant 0 : index
    %c0_3 = arith.constant 0 : index
    %2 = vector.load %arg3[%c0_2, %c0_3] : memref<8x4xf32, #tpu.memory_space<vmem>>, vector<8x4xf32>
    %3 = vector.extract_strided_slice %2 {offsets = [0, 0], sizes = [8, 1], strides = [1, 1]} : vector<8x4xf32> to vector<8x1xf32>
    %4 = vector.extract_strided_slice %1 {offsets = [0, 0], sizes = [1, 16], strides = [1, 1]} : vector<4x16xf32> to vector<1x16xf32>
    %5 = vector.broadcast %3 : vector<8x1xf32> to vector<8x16xf32>
    %6 = vector.broadcast %4 : vector<1x16xf32> to vector<8x16xf32>
    %7 = arith.mulf %5, %6 : vector<8x16xf32>
    %8 = vector.extract_strided_slice %2 {offsets = [0, 1], sizes = [8, 1], strides = [1, 1]} : vector<8x4xf32> to vector<8x1xf32>
    %9 = vector.extract_strided_slice %1 {offsets = [1, 0], sizes = [1, 16], strides = [1, 1]} : vector<4x16xf32> to vector<1x16xf32>
    %10 = vector.broadcast %8 : vector<8x1xf32> to vector<8x16xf32>
    %11 = vector.broadcast %9 : vector<1x16xf32> to vector<8x16xf32>
    %12 = arith.mulf %10, %11 : vector<8x16xf32>
    %13 = arith.addf %7, %12 : vector<8x16xf32>
    %14 = vector.extract_strided_slice %2 {offsets = [0, 2], sizes = [8, 1], strides = [1, 1]} : vector<8x4xf32> to vector<8x1xf32>
    %15 = vector.extract_strided_slice %1 {offsets = [2, 0], sizes = [1, 16], strides = [1, 1]} : vector<4x16xf32> to vector<1x16xf32>
    %16 = vector.broadcast %14 : vector<8x1xf32> to vector<8x16xf32>
    %17 = vector.broadcast %15 : vector<1x16xf32> to vector<8x16xf32>
    %18 = arith.mulf %16, %17 : vector<8x16xf32>
    %19 = arith.addf %13, %18 : vector<8x16xf32>
    %20 = vector.extract_strided_slice %2 {offsets = [0, 3], sizes = [8, 1], strides = [1, 1]} : vector<8x4xf32> to vector<8x1xf32>
    %21 = vector.extract_strided_slice %1 {offsets = [3, 0], sizes = [1, 16], strides = [1, 1]} : vector<4x16xf32> to vector<1x16xf32>
    %22 = vector.broadcast %20 : vector<8x1xf32> to vector<8x16xf32>
    %23 = vector.broadcast %21 : vector<1x16xf32> to vector<8x16xf32>
    %24 = arith.mulf %22, %23 : vector<8x16xf32>
    %25 = arith.addf %19, %24 : vector<8x16xf32>
    %c0_4 = arith.constant 0 : index
    %c0_5 = arith.constant 0 : index
    %26 = vector.load %arg4[%c0_4, %c0_5] : memref<8x1xf32, #tpu.memory_space<vmem>>, vector<8x1xf32>
    %27 = vector.broadcast %26 : vector<8x1xf32> to vector<8x16xf32>
    %28 = arith.addf %25, %27 : vector<8x16xf32>
    %c0_6 = arith.constant 0 : index
    %c0_7 = arith.constant 0 : index
    %c0_8 = arith.constant 0 : index
    %29 = vector.load %arg5[%c0_6, %c0_7, %c0_8] : memref<1x8x16xf32, #tpu.memory_space<vmem>>, vector<1x8x16xf32>
    %30 = vector.shape_cast %29 : vector<1x8x16xf32> to vector<8x16xf32>
    %31 = vector.shape_cast %28 : vector<8x16xf32> to vector<1x8x16xf32>
    tpu.vector_store %arg5[%c0_6, %c0_7, %c0_8], %31 {strides = array<i32>} : memref<1x8x16xf32, #tpu.memory_space<vmem>>, vector<1x8x16xf32>,
    return
  }
  func.func @transform_0(%arg0: i32, %arg1: i32) -> (i32, i32, i32) {
    %c0_i32 = arith.constant 0 : i32
    %c0_i32_0 = arith.constant 0 : i32
    return %arg0, %c0_i32, %arg1 : i32, i32, i32
  }
  func.func @transform_1(%arg0: i32, %arg1: i32) -> (i32, i32) {
    %c0_i32 = arith.constant 0 : i32
    %c0_i32_0 = arith.constant 0 : i32
    %c0_i32_1 = arith.constant 0 : i32
    return %c0_i32, %c0_i32_0 : i32, i32
  }
  func.func @transform_2(%arg0: i32, %arg1: i32) -> (i32, i32) {
    %c0_i32 = arith.constant 0 : i32
    %c0_i32_0 = arith.constant 0 : i32
    %c0_i32_1 = arith.constant 0 : i32
    return %c0_i32, %c0_i32_0 : i32, i32
  }
  func.func @transform_3(%arg0: i32, %arg1: i32) -> (i32, i32, i32) {
    %c0_i32 = arith.constant 0 : i32
    %c0_i32_0 = arith.constant 0 : i32
    return %arg0, %c0_i32, %arg1 : i32, i32, i32
  }
}

</mosaic_0001>

<bundles_post_ra>
// kernel: tpu_custom_call.1
= control target key start
LH: loop header
LB: loop body
LE: loop exit
PB: predicated region body
PF: predicated region fallthrough
CT: control target
= control target key end

     0   :  { %8 = vsyncpa [#allocation3], 0  ;;  %s601_s0 = inlined_call_operand.vmem [shape: f32[2,4,16], index: 0, kind: input, shape index: {}]   ;;  %s602_s1 = inlined_call_operand.vmem [shape: f32[8,4], index: 1, kind: input, shape index: {}]   ;;  %s603_s2 = inlined_call_operand.vmem [shape: f32[8,1], index: 2, kind: input, shape index: {}]   ;;  %s604_s3 = inlined_call_operand.hbm [shape: f32[2,8,16], index: 3, kind: output, shape index: {}]  }
   0x1   :  { %10 = vsyncpa [#allocation3 + $0x1], 0  ;;  %s498_s12 = smov 0   ;;  %s500_s13 = smov 0  }
   0x2   :  { %s502_s14 = smov 0   ;;  %s504_s15 = smov 0  }
   0x3   :  { %s506_s16 = smov 0   ;;  %s508_s17 = smov 0  }
   0x4 LB: > { %s318_s18 = sadd.s32 4294967295, %s472_s17   ;;  %s319_s19 = sadd.s32 4294967294, %s472_s17   ;;  %s472_s17 = sphi %s508_s17, %s16_s17   ;;  %s468_s16 = sphi %s506_s16, %s611_s16   ;;  %s464_s15 = sphi %s504_s15, %s610_s15   ;;  %s460_s14 = sphi %s502_s14, %s609_s14   ;;  %s456_s13 = sphi %s500_s13, %s608_s13   ;;  %s452_s12 = sphi %s498_s12, %s607_s12  }
   0x5   : > { %s28_s20 = sadd.s32 1, %s468_s16  ;;  %s107_s21 = sadd.s32 1, %s460_s14 }
   0x6   : > { %p30_p0 = scmp.ge.s32.totalorder %s28_s20, 2  ;;  %p117_p1 = scmp.ne.s32.totalorder %s460_s14, %s456_s13 }
   0x7   : > { %p118_p2 = scmp.eq.s32.totalorder %s318_s18, 1  ;;  %p123_p3 = scmp.ne.s32.totalorder %s456_s13, %s452_s12 }
   0x8   : > { %s613_s20 = smov (%p30_p0, %s28_s20), 0  ;;  %p124_p5 = scmp.eq.s32.totalorder %s319_s19, 1 }
   0x9   : > { %p538_p4 = por %p118_p2, %p117_p1  ;;  %s102_s23 = ssub.s32 %s468_s16, %s613_s20 }
   0xa   : > { %p322_p6 = scmp.ge.s32.totalorder %s472_s17, 1  ;;  %p105_p7 = scmp.eq.s32.totalorder %s102_s23, 0 }
   0xb   : > { %p545_p8 = por %p124_p5, %p123_p3  ;;  %p158_p9 = scmp.lt.s32.totalorder %s472_s17, 3 }
   0xc   : > { %s551_s25 = scalar_select %p105_p7, %s460_s14, %s107_s21  }
   0xd   : > { %p159_p10 = pnand %p322_p6, %p158_p9 }
   0xe   : > { %p184_p11 = scmp.lt.s32.totalorder (!%p159_p10), %s464_s15, 1  ;;  %s181_s8 = sand.u32 (!%p159_p10), 1, %s456_s13  }
   0xf   : > { %162 = sbr.rel (%p159_p10) target bundleno = 159 (0x9f), region = 32  ;;  %s323_s9 = sshll.u32 (!%p159_p10), %s181_s8, 3 }
  0x10   : > { %s326_s10 = sshll.u32 (!%p159_p10), %s464_s15, 3  ;;  %s183_s21 = scalar_lea.vmem (!%p159_p10), [#allocation2], %s323_s9 }
  0x11   : > { %s242_s19 = scalar_lea.hbm (!%p159_p10), %s604_s3, %s326_s10  ;;  %s244_s23 = sshll.u32 (!%p159_p10), %s183_s21, 4  ;;  %s245_s23 = int_to_ptr.vmem [resolvable:$true] %s244_s23 }
  0x12   : > { %s246_s26 = sshll.u32 (!%p159_p10), %s242_s19, 4  ;;  %s247_s26 = int_to_ptr.hbm [resolvable:$true] %s246_s26 }
  0x13   : > { %s408_s27 = sshra.s32 (!%p159_p10), %s247_s26, 4  ;;  %s409_s27 = int_to_ptr.hbm [resolvable:$true] %s408_s27 }
  0x14   : > { %v192_v0 = vld [vmem:[%s602_s1] sm:$0xff]  ;;  %v474_v1 = vmov 0   ;;  %v475_v2 = vmov 2   ;;  %v476_v4 = vmov 1   ;;  %v477_v5 = vmov 3   ;;  %s185_s30 = scalar_select %p184_p11, %s464_s15, 1 }
  0x15   : > { %388 = vset.pattern.permute.xlu0 %v474_v1  ;;  %390 = vset.pattern.permute.xlu1 %v475_v2  ;;  %v221_v3 = vld [vmem:[%s603_s2] sm:$0xff]  ;;  %vm228_vm0 = vcmask 130048   ;;  %s231_s15 = scalar_lea.sflag [#allocation3], %s181_s8  ;;  %s410_s28 = scalar_lea.hbm %s409_s27, 8 }
  0x16   : > { %195 = vperm.xlu0 %388, %v192_v0   ;;  %208 = vperm.xlu1 %390, %v192_v0   ;;  %s324_s4 = sshll.u32 %s185_s30, 2  ;;  %p411_p12 = scmp.ne.s32.totalorder %s409_s27, %s410_s28 }
  0x17   : > { %392 = vset.pattern.permute.xlu2 %v474_v1  ;;  %s190_s7 = scalar_lea.vmem %s601_s0, %s324_s4  ;;  %s414_s4 = scalar_lea.hbm %s604_s3, 16 }
  0x18   : > { %224 = vperm.xlu2 %392, %v221_v3   ;;  %v191_v8 = vld [vmem:[%s190_s7] sm:$0xf]  ;;  %p412_p13 = pnand %p411_p12, %p538_p4  ;;  %p415_p1 = scmp.lt.s32.totalorder %s409_s27, %s604_s3 }
  0x19   : > { %v198_v9 = vperm.slane %v191_v8, 0  ;;  %v204_v10 = vperm.slane %v191_v8, 1  ;;  %v211_v11 = vperm.slane %v191_v8, 2  ;;  %v218_v12 = vperm.slane %v191_v8, 3  ;;  %p416_p2 = scmp.lt.s32.totalorder %s414_s4, %s410_s28 }
  0x1a   : > { %p413_p0 = pneg %p412_p13 }
  0x1b   : > { %p417_p3 = por %p416_p2, %p415_p1 }
  0x1d   : > { %p418_p5 = pnand %p417_p3, %p413_p0 }
  0x1e   : > { %389 = vset.pattern.permute.xlu0 %v476_v4  ;;  %391 = vset.pattern.permute.xlu1 %v477_v5 }
  0x1f   : > { %201 = vperm.xlu0 %389, %v192_v0   ;;  %215 = vperm.xlu1 %391, %v192_v0  }
  0x27   : > { %393 = vset.pattern.permute.xlu0 %v474_v1 }
  0x72   : > { %v225_v21 = vpop.permute.xlu2 %224 }
  0x88   : > { %v196_v6 = vpop.permute.xlu0 %195  ;;  %v209_v7 = vpop.permute.xlu1 %208 }
  0x89   : > { %v199_v15 = vmul.f32 %v198_v9, %v196_v6  ;;  %v212_v17 = vmul.f32 %v211_v11, %v209_v7 }
  0x91   : > { %v202_v13 = vpop.permute.xlu0 %201  ;;  %v216_v14 = vpop.permute.xlu1 %215 }
  0x92   : > { %v205_v16 = vmul.f32 %v204_v10, %v202_v13  ;;  %v219_v19 = vmul.f32 %v218_v12, %v216_v14 }
  0x94   : > { %v206_v18 = vadd.f32 %v205_v16, %v199_v15 }
  0x96   : > { %v213_v20 = vadd.f32 %v212_v17, %v206_v18 }
  0x98   : > { %v220_v22 = vadd.f32 %v219_v19, %v213_v20 }
  0x9a   : > { %v227_v23 = vadd.f32 %v225_v21, %v220_v22 }
  0x9c   : > { %229 = vst.msk [vmem:[%s183_s21] sm:$0xff] %vm228_vm0, %v227_v23 }
  0x9d   : > { %421 = shalt.err (!%p418_p5)
}
  0x9e   : > { %329 = dma.vmem_to_hbm [thread:$0]  (%p538_p4), %s245_s23, 128, %s247_s26, %s231_s15  }
  0x9f PF: > { %p335_p6 = scmp.ge.s32.totalorder %s472_s17, 2  ;;  %s258_s7 = sand.u32 1, %s452_s12  }
  0xa0   : > { %s259_s8 = scalar_lea.sflag [#allocation3], %s258_s7 }
  0xa1   : > { %p332_p7 = pnand %p335_p6, %p545_p8 }
  0xa3   : > { %p333_p9 = pneg %p332_p7 }
  0xa5   : > { %447 = dma.done.wait (%p333_p9), %s259_s8, 128  }
  0xa6   : > { %449 = vsyncadd (%p333_p9), %s259_s8, 4294967168  ;;  %s16_s17 = sadd.s32 1, %s472_s17   ;;  %s607_s12 = smov %s456_s13 }
  0xa7   : > { %p13_p10 = scmp.ge.s32.totalorder %s16_s17, 4   ;;  %s608_s13 = smov %s460_s14 }
  0xa8   : > { %s609_s14 = smov %s551_s25  ;;  %s610_s15 = smov %s468_s16 }
  0xa9   : > { %s611_s16 = smov %s613_s20  ;;  %15 = sbr.rel (!%p13_p10) target bundleno = 4 (0x4), region = 67 }
  0xae   :  { %265 = vsyncpa [#allocation3], 1 }
  0xaf   :  { %267 = vsyncpa [#allocation3 + $0x1], 1 }

</bundles_post_ra>
